<compile_context>
chip_gen: v6e
topology: v6e:2x2x1
jax: 0.10.0
libtpu: 0.0.40
codegen_flags: <defaults>
</compile_context>

<pallas_src>
import functools

import jax
import jax.numpy as jnp
from jax import lax
from jax.experimental import pallas as pl
from jax.experimental.pallas import tpu as pltpu


def _round_up(x, m):
    return (x + m - 1) // m * m


def _mlp_kernel(s_ref, x_ref, w1_ref, b1_ref, w2_ref, b2_ref, o_ref):
    """Fused: relu((x @ W1) * s1 + b1) @ W2 * s2 + b2.

    s_ref : SMEM (1, 2) f32   -- weight_norm scales g/||V||_F for both layers
    x_ref : VMEM (TM, in_dim)     f32 (cast to bf16 in-kernel for the MXU)
    w1_ref: VMEM (in_dim, hid)    bf16 (pre-transposed -> plain (M,K)x(K,N))
    b1_ref: VMEM (1, hid)         f32
    w2_ref: VMEM (hid, out_dim)   bf16 (pre-transposed)
    b2_ref: VMEM (1, out_dim)     f32
    o_ref : VMEM (TM, out_dim)    x.dtype
    """
    s1 = s_ref[0, 0]
    s2 = s_ref[0, 1]

    # Layer 1: bf16 operands on the MXU, f32 accumulation.
    x = x_ref[...].astype(jnp.bfloat16)
    h = jnp.dot(x, w1_ref[...], preferred_element_type=jnp.float32)  # (TM, hid) f32
    h = h * s1 + b1_ref[...]                                         # f32 elementwise
    h = jnp.maximum(h, 0.0)                                          # ReLU
    # Dropout (eval/inference) == identity.

    # Layer 2: cast only the dot operand to bf16, keep the f32 accumulator.
    o = jnp.dot(h.astype(jnp.bfloat16), w2_ref[...],
                preferred_element_type=jnp.float32)                  # (TM, out_dim) f32
    o = o * s2 + b2_ref[...]
    o_ref[...] = o.astype(o_ref.dtype)


@functools.partial(jax.jit, static_argnames=("block_rows",))
def simple_classifier_forward(x, v1, g1, b1, v2, g2, b2, *, block_rows=256):
    """x: (B, in_dim). Torch-layout params: v1 (hid, in), b1 (hid,), v2 (out, hid), b2 (out,)."""
    B, in_dim = x.shape
    hid_dim = v1.shape[0]
    out_dim = v2.shape[0]

    # weight_norm(dim=None): W_eff = g * V / ||V||_F.  Only the scalar scales
    # are computed here; no scaled weight matrices are materialized.
    s1 = (g1 / jnp.linalg.norm(v1)).astype(jnp.float32)
    s2 = (g2 / jnp.linalg.norm(v2)).astype(jnp.float32)
    scales = jnp.stack([s1, s2]).reshape(1, 2)

    # One-time, tiny weight transposes (XLA side) -> plain (M,K)x(K,N) matmuls
    # in the kernel; no per-grid-step XLU transpose of the RHS.
    w1_t = v1.T.astype(jnp.bfloat16)                            # (in_dim, hid)
    w2_t = v2.T.astype(jnp.bfloat16)                            # (hid, out_dim)
    b1_2d = b1.astype(jnp.float32).reshape(1, hid_dim)
    b2_2d = b2.astype(jnp.float32).reshape(1, out_dim)

    # Batch tile: as large as possible (fewer grid steps), multiple of 8 sublanes.
    # Per-step VMEM footprint stays tiny at these model dims, so no explicit
    # vmem_limit_bytes is needed on v5e/v6e/v7x.
    tm = min(block_rows, _round_up(B, 8))
    grid = (pl.cdiv(B, tm),)   # ragged last block handled by Pallas (OOB writes dropped)

    out = pl.pallas_call(
        _mlp_kernel,
        out_shape=jax.ShapeDtypeStruct((B, out_dim), x.dtype),
        grid=grid,
        in_specs=[
            pl.BlockSpec(memory_space=pltpu.MemorySpace.SMEM),       # scales (1,2)
            pl.BlockSpec((tm, in_dim), lambda i: (i, 0)),            # x tile (no pre-pad)
            pl.BlockSpec((in_dim, hid_dim), lambda i: (0, 0)),       # W1 (VMEM-resident)
            pl.BlockSpec((1, hid_dim), lambda i: (0, 0)),            # b1
            pl.BlockSpec((hid_dim, out_dim), lambda i: (0, 0)),      # W2 (VMEM-resident)
            pl.BlockSpec((1, out_dim), lambda i: (0, 0)),            # b2
        ],
        out_specs=pl.BlockSpec((tm, out_dim), lambda i: (i, 0)),     # direct (B,out) store
        compiler_params=pltpu.CompilerParams(
            dimension_semantics=("parallel",)),   # batch tiles independent (v7x sharding)
    )(scales, x, w1_t, b1_2d, w2_t, b2_2d)

    return out


def _reference_f32(x, v1, g1, b1, v2, g2, b2):
    w1 = g1 * v1 / jnp.linalg.norm(v1)
    w2 = g2 * v2 / jnp.linalg.norm(v2)
    h = jnp.maximum(x @ w1.T + b1, 0.0)
    return h @ w2.T + b2


def _reference_bf16(x, v1, g1, b1, v2, g2, b2):
    # Matches the kernel's numerics (bf16 MXU operands, f32 accumulation).
    s1 = g1 / jnp.linalg.norm(v1)
    s2 = g2 / jnp.linalg.norm(v2)
    h = lax.dot_general(x.astype(jnp.bfloat16), v1.astype(jnp.bfloat16),
                        (((1,), (1,)), ((), ())),
                        preferred_element_type=jnp.float32) * s1 + b1
    h = jnp.maximum(h, 0.0)
    o = lax.dot_general(h.astype(jnp.bfloat16), v2.astype(jnp.bfloat16),
                        (((1,), (1,)), ((), ())),
                        preferred_element_type=jnp.float32) * s2 + b2
    return o


if __name__ == "__main__":
    in_dim, hid_dim, out_dim = 32, 64, 16

    key = jax.random.PRNGKey(0)
    k_x, k_v1, k_b1, k_v2, k_b2 = jax.random.split(key, 5)

    # Deterministic params, torch-layout weight shapes (out, in).
    v1 = jax.random.normal(k_v1, (hid_dim, in_dim), dtype=jnp.float32) * 0.1
    b1 = jax.random.normal(k_b1, (hid_dim,), dtype=jnp.float32) * 0.1
    g1 = jnp.linalg.norm(v1)   # weight_norm init: g = ||v|| so W_eff == v initially
    v2 = jax.random.normal(k_v2, (out_dim, hid_dim), dtype=jnp.float32) * 0.1
    b2 = jax.random.normal(k_b2, (out_dim,), dtype=jnp.float32) * 0.1
    g2 = jnp.linalg.norm(v2)

    for B in (512, 300):   # 512 -> grid=(2,) even split; 300 -> ragged last tile
        x = jax.random.normal(k_x, (B, in_dim), dtype=jnp.float32)

        logits = simple_classifier_forward(x, v1, g1, b1, v2, g2, b2)
        logits = jax.block_until_ready(logits)
        assert logits.shape == (B, out_dim)

        # Tight check against a precision-matched (bf16-operand) reference.
        ref_bf16 = _reference_bf16(x, v1, g1, b1, v2, g2, b2)
        assert jnp.allclose(logits, ref_bf16, atol=2e-3, rtol=2e-3), \
            float(jnp.max(jnp.abs(logits - ref_bf16)))

        # Loose check against the full-f32 PyTorch-equivalent reference.
        ref_f32 = _reference_f32(x, v1, g1, b1, v2, g2, b2)
        assert jnp.allclose(logits, ref_f32, atol=5e-2, rtol=5e-2), \
            float(jnp.max(jnp.abs(logits - ref_f32)))

    print("KERNEL_OK")
</pallas_src>

<mosaic_0001>
module attributes {stable_mosaic.version = 11 : i64} {
  func.func @_mlp_kernel(%arg0: i32, %arg1: memref<1x2xf32, #tpu.memory_space<smem>>, %arg2: memref<256x32xf32, #tpu.memory_space<vmem>>, %arg3: memref<32x64xbf16, #tpu.memory_space<vmem>>, %arg4: memref<1x64xf32, #tpu.memory_space<vmem>>, %arg5: memref<64x16xbf16, #tpu.memory_space<vmem>>, %arg6: memref<1x16xf32, #tpu.memory_space<vmem>>, %arg7: memref<256x16xf32, #tpu.memory_space<vmem>>) attributes {dimension_semantics = [#tpu.dimension_semantics<parallel>], iteration_bounds = array<i64: 2>, scalar_prefetch = 0 : i64, scratch_operands = 0 : i64, tpu.core_type = #tpu.core_type<tc>, window_params = [{transform_indices = @transform_0, window_bounds = array<i64: 1, 2>}, {transform_indices = @transform_1, window_bounds = array<i64: 256, 32>}, {pipeline_mode = #tpu.pipeline_mode<synchronous>, transform_indices = @transform_2, window_bounds = array<i64: 32, 64>}, {pipeline_mode = #tpu.pipeline_mode<synchronous>, transform_indices = @transform_3, window_bounds = array<i64: 1, 64>}, {pipeline_mode = #tpu.pipeline_mode<synchronous>, transform_indices = @transform_4, window_bounds = array<i64: 64, 16>}, {pipeline_mode = #tpu.pipeline_mode<synchronous>, transform_indices = @transform_5, window_bounds = array<i64: 1, 16>}, {transform_indices = @transform_6, window_bounds = array<i64: 256, 16>}]} {
    %c0 = arith.constant 0 : index
    %c0_0 = arith.constant 0 : index
    %0 = memref.load %arg1[%c0, %c0_0] : memref<1x2xf32, #tpu.memory_space<smem>>
    %c0_1 = arith.constant 0 : index
    %c1 = arith.constant 1 : index
    %1 = memref.load %arg1[%c0_1, %c1] : memref<1x2xf32, #tpu.memory_space<smem>>
    %c0_2 = arith.constant 0 : index
    %c0_3 = arith.constant 0 : index
    %2 = vector.load %arg2[%c0_2, %c0_3] : memref<256x32xf32, #tpu.memory_space<vmem>>, vector<256x32xf32>
    %3 = arith.truncf %2 : vector<256x32xf32> to vector<256x32xbf16>
    %c0_4 = arith.constant 0 : index
    %c0_5 = arith.constant 0 : index
    %4 = vector.load %arg3[%c0_4, %c0_5] : memref<32x64xbf16, #tpu.memory_space<vmem>>, vector<32x64xbf16>
    %cst = arith.constant dense<0.000000e+00> : vector<256x64xf32>
    %5 = tpu.matmul %3, %4, %cst {dimension_numbers = #tpu.dot_dimension_numbers<[1], [0], [0], [1], [0, 0, 1, 1], [], []>} : vector<256x32xbf16>, vector<32x64xbf16>, vector<256x64xf32> -> vector<256x64xf32>
    %6 = vector.broadcast %0 : f32 to vector<256x64xf32>
    %7 = arith.mulf %5, %6 : vector<256x64xf32>
    %c0_6 = arith.constant 0 : index
    %c0_7 = arith.constant 0 : index
    %8 = vector.load %arg4[%c0_6, %c0_7] : memref<1x64xf32, #tpu.memory_space<vmem>>, vector<1x64xf32>
    %9 = vector.broadcast %8 : vector<1x64xf32> to vector<256x64xf32>
    %10 = arith.addf %7, %9 : vector<256x64xf32>
    %cst_8 = arith.constant 0.000000e+00 : f32
    %11 = vector.broadcast %cst_8 : f32 to vector<256x64xf32>
    %12 = arith.maximumf %10, %11 : vector<256x64xf32>
    %13 = arith.truncf %12 : vector<256x64xf32> to vector<256x64xbf16>
    %c0_9 = arith.constant 0 : index
    %c0_10 = arith.constant 0 : index
    %14 = vector.load %arg5[%c0_9, %c0_10] : memref<64x16xbf16, #tpu.memory_space<vmem>>, vector<64x16xbf16>
    %cst_11 = arith.constant dense<0.000000e+00> : vector<256x16xf32>
    %15 = tpu.matmul %13, %14, %cst_11 {dimension_numbers = #tpu.dot_dimension_numbers<[1], [0], [0], [1], [0, 0, 1, 1], [], []>} : vector<256x64xbf16>, vector<64x16xbf16>, vector<256x16xf32> -> vector<256x16xf32>
    %16 = vector.broadcast %1 : f32 to vector<256x16xf32>
    %17 = arith.mulf %15, %16 : vector<256x16xf32>
    %c0_12 = arith.constant 0 : index
    %c0_13 = arith.constant 0 : index
    %18 = vector.load %arg6[%c0_12, %c0_13] : memref<1x16xf32, #tpu.memory_space<vmem>>, vector<1x16xf32>
    %19 = vector.broadcast %18 : vector<1x16xf32> to vector<256x16xf32>
    %20 = arith.addf %17, %19 : vector<256x16xf32>
    %c0_14 = arith.constant 0 : index
    %c0_15 = arith.constant 0 : index
    %21 = vector.load %arg7[%c0_14, %c0_15] : memref<256x16xf32, #tpu.memory_space<vmem>>, vector<256x16xf32>
    tpu.vector_store %arg7[%c0_14, %c0_15], %20 {strides = array<i32>} : memref<256x16xf32, #tpu.memory_space<vmem>>, vector<256x16xf32>,
    return
  }
  func.func @transform_0(%arg0: i32) -> (i32, i32) {
    %c0_i32 = arith.constant 0 : i32
    %c0_i32_0 = arith.constant 0 : i32
    %c0_i32_1 = arith.constant 0 : i32
    return %c0_i32, %c0_i32_0 : i32, i32
  }
  func.func @transform_1(%arg0: i32) -> (i32, i32) {
    %c0_i32 = arith.constant 0 : i32
    %c0_i32_0 = arith.constant 0 : i32
    return %arg0, %c0_i32 : i32, i32
  }
  func.func @transform_2(%arg0: i32) -> (i32, i32) {
    %c0_i32 = arith.constant 0 : i32
    %c0_i32_0 = arith.constant 0 : i32
    %c0_i32_1 = arith.constant 0 : i32
    return %c0_i32, %c0_i32_0 : i32, i32
  }
  func.func @transform_3(%arg0: i32) -> (i32, i32) {
    %c0_i32 = arith.constant 0 : i32
    %c0_i32_0 = arith.constant 0 : i32
    %c0_i32_1 = arith.constant 0 : i32
    return %c0_i32, %c0_i32_0 : i32, i32
  }
  func.func @transform_4(%arg0: i32) -> (i32, i32) {
    %c0_i32 = arith.constant 0 : i32
    %c0_i32_0 = arith.constant 0 : i32
    %c0_i32_1 = arith.constant 0 : i32
    return %c0_i32, %c0_i32_0 : i32, i32
  }
  func.func @transform_5(%arg0: i32) -> (i32, i32) {
    %c0_i32 = arith.constant 0 : i32
    %c0_i32_0 = arith.constant 0 : i32
    %c0_i32_1 = arith.constant 0 : i32
    return %c0_i32, %c0_i32_0 : i32, i32
  }
  func.func @transform_6(%arg0: i32) -> (i32, i32) {
    %c0_i32 = arith.constant 0 : i32
    %c0_i32_0 = arith.constant 0 : i32
    return %arg0, %c0_i32 : i32, i32
  }
}

</mosaic_0001>

<bundles_post_ra>
// kernel: simple_classifier_forward.1
= control target key start
LH: loop header
LB: loop body
LE: loop exit
PB: predicated region body
PF: predicated region fallthrough
CT: control target
= control target key end

     0   :  { %11 = vsyncpa [#allocation3], 0  ;;  %s1337_s21 = smov 0   ;;  %s1674_s0 = inlined_call_operand.vmem [shape: f32[1,2], index: 0, kind: input, shape index: {}]   ;;  %s1675_s1 = inlined_call_operand.vmem [shape: f32[512,32], index: 1, kind: input, shape index: {}]   ;;  %s1676_s2 = inlined_call_operand.vmem [shape: bf16[32,64], index: 2, kind: input, shape index: {}]   ;;  %s1677_s3 = inlined_call_operand.vmem [shape: f32[1,64], index: 3, kind: input, shape index: {}]   ;;  %s1678_s4 = inlined_call_operand.vmem [shape: bf16[64,16], index: 4, kind: input, shape index: {}]   ;;  %s1679_s5 = inlined_call_operand.vmem [shape: f32[1,16], index: 5, kind: input, shape index: {}]   ;;  %s1680_s6 = inlined_call_operand.vmem [shape: f32[512,16], index: 6, kind: output, shape index: {}]  }
   0x1 LB: > { %s1081_s22 = sadd.s32 4294967295, %s1299_s21   ;;  %p1083_p0 = scmp.ge.s32.totalorder %s1299_s21, 1  ;;  %s1299_s21 = sphi %s1337_s21, %s17_s21  }
   0x2   : > { %p179_p1 = scmp.lt.s32.totalorder %s1299_s21, 3  ;;  %s192_s25 = sshll.u32 %s1674_s0, 4  ;;  %s193_s25 = int_to_ptr.vmem [resolvable:$true] %s192_s25 }
   0x3   : > { %p1352_p3 = scmp.eq.s32.totalorder %s1081_s22, 0  ;;  %s1274_s28 = scalar_lea.vmem %s193_s25, 16 }
   0x4   : > { %p1348_p2 = pnand %p1083_p0, %p179_p1  ;;  %p1275_p6 = scmp.ne.s32.totalorder %s193_s25, %s1274_s28 }
   0x5   : > { %p1282_p10 = scmp.lt.s32.totalorder %s193_s25, %s193_s25  ;;  %p1283_p11 = scmp.lt.s32.totalorder %s1274_s28, %s1274_s28 }
   0x6   : > { %p1253_p4 = pneg %p1348_p2 }
   0x7   : > { %p1284_p12 = por %p1283_p11, %p1282_p10 }
   0x8   : > { %p1254_p5 = pnand %p1352_p3, %p1253_p4 }
   0xa   : > { %p1276_p7 = pneg %p1254_p5 }
   0xc   : > { %p1277_p8 = pnand %p1276_p7, %p1275_p6 }
   0xe   : > { %p1278_p9 = pneg %p1277_p8 }
  0x10   : > { %p1285_p13 = pnand %p1284_p12, %p1278_p9 }
  0x12   : > { %1288 = shalt.err (!%p1285_p13)
}
  0x13   : > { %s1301_s29 = smov [#allocation2]   ;;  %226 = sbr.rel (%p1348_p2) target bundleno = 505 (0x1f9), region = 44 }
  0x14   : > { %1256 = dma.vmem_to_smem (!%p1254_p5), %s193_s25, 16, %s1301_s29, [#allocation3]  }
  0x18   : > { %1294 = dma.done.wait (%p1352_p3), [#allocation3], 16  }
  0x19   : > { %1296 = vsyncadd (%p1352_p3), [#allocation3], 4294967280 }
  0x1a   : > { %232 = sfence }
  0x1b   : > { %v1268_v0 = vld [vmem:[%s1676_s2 + $0x8] sm:$0xff]   ;;  %s1088_s8 = sshll.u32 %s1081_s22, 5  ;;  %v1269_v1 = vld [vmem:[%s1676_s2] sm:$0xff]   ;;  %vm336_vm0 = vcmask 261120   ;;  %v1270_v50 = vld [vmem:[%s1678_s4 + $0x18] sm:$0xff]   ;;  %s270_s24 = sld [smem:[#allocation2]] }
  0x1c   : > { %p258_p0 = scmp.lt.s32.totalorder %s1088_s8, 63  ;;  %1173 = vmatprep.subr.bf16.mxu0 %v1268_v0  ;;  %1209 = vmatprep.subr.bf16.mxu1 %v1270_v50  ;;  %v1271_v51 = vld [vmem:[%s1678_s4 + $0x10] sm:$0xff]   ;;  %v1272_v52 = vld [vmem:[%s1678_s4 + $0x8] sm:$0xff]   ;;  %v1273_v53 = vld [vmem:[%s1678_s4] sm:$0xff]   ;;  %vm698_vm1 = vcmask 523264   ;;  %s1092_s27 = sld [smem:[#allocation2 + $0x1]] }
  0x1d   : > { %1174 = vmatpush3.bf16.msra.mxu0 %v1268_v0  ;;  %1210 = vmatpush3.bf16.msra.mxu1 %v1270_v50  ;;  %v1449_v60 = vld [vmem:[%s1677_s3] ss:$0 sm:$0xff]  ;;  %vm980_vm2 = vcmask 130048  }
  0x1e   : > { %s1684_s8 = smov (!%p258_p0, %s1088_s8), 63  ;;  %1175 = vmatprep.subr.bf16.mxu0 %v1269_v1  ;;  %1211 = vmatprep.subr.bf16.mxu1 %v1271_v51 }
  0x1f   : > { %s1089_s11 = sshll.u32 %s1684_s8, 3 }
  0x20   : > { %s1380_s14 = scalar_lea.vmem %s1675_s1, %s1089_s11  ;;  %s1542_s9 = scalar_lea.vmem %s1680_s6, %s1089_s11 }
  0x21   : > { %1176 = vmatpush3.bf16.msra.mxu0 %v1269_v1  ;;  %v272_v2 = vld [vmem:[%s1380_s14] sm:$0xff]  ;;  %v273_v3 = vld [vmem:[%s1380_s14 + $0x8] sm:$0xff]  ;;  %v274_v4 = vld [vmem:[%s1380_s14 + $0x10] sm:$0xff]  ;;  %1212 = vmatpush3.bf16.msra.mxu1 %v1271_v51  ;;  %v1442_v55 = vstv %s270_s24 }
  0x22   : > { %v304_v5 = vpack.c.bf16 %v273_v3, %v272_v2  ;;  %v275_v6 = vld [vmem:[%s1380_s14 + $0x18] sm:$0xff]  ;;  %v276_v7 = vld [vmem:[%s1380_s14 + $0x20] sm:$0xff]  ;;  %v277_v8 = vld [vmem:[%s1380_s14 + $0x28] sm:$0xff]  ;;  %1213 = vmatprep.subr.bf16.mxu1 %v1272_v52 }
  0x23   : > { %v305_v9 = vpack.c.bf16 %v275_v6, %v274_v4  ;;  %v306_v10 = vpack.c.bf16 %v277_v8, %v276_v7  ;;  %v278_v11 = vld [vmem:[%s1380_s14 + $0x30] sm:$0xff]  ;;  %v279_v12 = vld [vmem:[%s1380_s14 + $0x38] sm:$0xff]  ;;  %v280_v13 = vld [vmem:[%s1380_s14 + $0x40] sm:$0xff] }
  0x24   : > { %1177 = vmatprep.mubr.msk.bf16.mxu0 %vm336_vm0, %v304_v5  ;;  %v281_v14 = vld [vmem:[%s1380_s14 + $0x48] sm:$0xff]  ;;  %v307_v15 = vpack.c.bf16 %v279_v12, %v278_v11  ;;  %v282_v17 = vld [vmem:[%s1380_s14 + $0x50] sm:$0xff]  ;;  %v283_v18 = vld [vmem:[%s1380_s14 + $0x58] sm:$0xff] }
  0x25   : > { %1178 = vmatmul.mubr.msk.bf16.vlgmr.msra.gmra.mxu0 %vm336_vm0, %v305_v9  ;;  %v308_v16 = vpack.c.bf16 %v281_v14, %v280_v13  ;;  %v284_v19 = vld [vmem:[%s1380_s14 + $0x60] sm:$0xff]  ;;  %v285_v20 = vld [vmem:[%s1380_s14 + $0x68] sm:$0xff]  ;;  %v309_v21 = vpack.c.bf16 %v283_v18, %v282_v17  ;;  %v286_v23 = vld [vmem:[%s1380_s14 + $0x70] sm:$0xff]  ;;  %1214 = vmatpush3.bf16.msra.mxu1 %v1272_v52 }
  0x26   : > { %1181 = vmatprep.mubr.msk.bf16.mxu0 %vm336_vm0, %v306_v10  ;;  %v310_v22 = vpack.c.bf16 %v285_v20, %v284_v19  ;;  %v287_v24 = vld [vmem:[%s1380_s14 + $0x78] sm:$0xff]  ;;  %v288_v25 = vld [vmem:[%s1380_s14 + $0x80] sm:$0xff]  ;;  %v289_v26 = vld [vmem:[%s1380_s14 + $0x88] sm:$0xff]  ;;  %1215 = vmatprep.subr.bf16.mxu1 %v1273_v53 }
  0x27   : > { %v311_v27 = vpack.c.bf16 %v287_v24, %v286_v23  ;;  %v312_v28 = vpack.c.bf16 %v289_v26, %v288_v25  ;;  %v290_v29 = vld [vmem:[%s1380_s14 + $0x90] sm:$0xff]  ;;  %v291_v30 = vld [vmem:[%s1380_s14 + $0x98] sm:$0xff]  ;;  %v292_v31 = vld [vmem:[%s1380_s14 + $0xa0] sm:$0xff] }
  0x28   : > { %v293_v32 = vld [vmem:[%s1380_s14 + $0xa8] sm:$0xff]  ;;  %v313_v33 = vpack.c.bf16 %v291_v30, %v290_v29  ;;  %v294_v35 = vld [vmem:[%s1380_s14 + $0xb0] sm:$0xff]  ;;  %v295_v36 = vld [vmem:[%s1380_s14 + $0xb8] sm:$0xff] }
  0x29   : > { %v314_v34 = vpack.c.bf16 %v293_v32, %v292_v31  ;;  %v296_v37 = vld [vmem:[%s1380_s14 + $0xc0] sm:$0xff]  ;;  %v297_v38 = vld [vmem:[%s1380_s14 + $0xc8] sm:$0xff]  ;;  %v315_v39 = vpack.c.bf16 %v295_v36, %v294_v35  ;;  %v298_v41 = vld [vmem:[%s1380_s14 + $0xd0] sm:$0xff]  ;;  %1216 = vmatpush3.bf16.msra.mxu1 %v1273_v53 }
  0x2a   : > { %v316_v40 = vpack.c.bf16 %v297_v38, %v296_v37  ;;  %v299_v42 = vld [vmem:[%s1380_s14 + $0xd8] sm:$0xff]  ;;  %v300_v43 = vld [vmem:[%s1380_s14 + $0xe0] sm:$0xff]  ;;  %v301_v44 = vld [vmem:[%s1380_s14 + $0xe8] sm:$0xff] }
  0x2b   : > { %v317_v45 = vpack.c.bf16 %v299_v42, %v298_v41  ;;  %v318_v46 = vpack.c.bf16 %v301_v44, %v300_v43  ;;  %v302_v47 = vld [vmem:[%s1380_s14 + $0xf0] sm:$0xff]  ;;  %v303_v48 = vld [vmem:[%s1380_s14 + $0xf8] sm:$0xff] }
  0x2c   : > { %v319_v49 = vpack.c.bf16 %v303_v48, %v302_v47 }
  0x2d   : > { %1182 = vmatmul.mubr.msk.bf16.gmra.mxu0 %vm336_vm0, %v307_v15 }
  0x2e   : > { %1185 = vmatprep.mubr.msk.bf16.mxu0 %vm336_vm0, %v308_v16 }
  0x35   : > { %1186 = vmatmul.mubr.msk.bf16.gmra.mxu0 %vm336_vm0, %v309_v21 }
  0x36   : > { %1189 = vmatprep.mubr.msk.bf16.mxu0 %vm336_vm0, %v310_v22 }
  0x3d   : > { %1190 = vmatmul.mubr.msk.bf16.gmra.mxu0 %vm336_vm0, %v311_v27 }
  0x3e   : > { %1193 = vmatprep.mubr.msk.bf16.mxu0 %vm336_vm0, %v312_v28 }
  0x45   : > { %1194 = vmatmul.mubr.msk.bf16.gmra.mxu0 %vm336_vm0, %v313_v33 }
  0x46   : > { %1197 = vmatprep.mubr.msk.bf16.mxu0 %vm336_vm0, %v314_v34 }
  0x4d   : > { %1198 = vmatmul.mubr.msk.bf16.gmra.mxu0 %vm336_vm0, %v315_v39 }
  0x4e   : > { %1201 = vmatprep.mubr.msk.bf16.mxu0 %vm336_vm0, %v316_v40 }
  0x55   : > { %1202 = vmatmul.mubr.msk.bf16.gmra.mxu0 %vm336_vm0, %v317_v45 }
  0x56   : > { %1205 = vmatprep.mubr.msk.bf16.mxu0 %vm336_vm0, %v318_v46 }
  0x5d   : > { %1206 = vmatmul.mubr.msk.bf16.gmra.mxu0 %vm336_vm0, %v319_v49 }
  0xe5   : > { %v1179_v54 = vpop.f32.mrf.mxu0 }
  0xe6   : > { %v549_v58 = vmul.f32 %v1179_v54, %v1442_v55 }
  0xe7   : > { %v419_v56 = vpop.f32.mrf.mxu0 }
  0xe8   : > { %v547_v57 = vmul.f32 %v1442_v55, %v419_v56  ;;  %v588_v2 = vadd.f32 %v1449_v60, %v549_v58 }
  0xe9   : > { %v1180_v59 = vpop.f32.mrf.mxu0 }
  0xea   : > { %v550_v61 = vmul.f32 %v1180_v59, %v1442_v55  ;;  %v586_v63 = vadd.f32 %v1449_v60, %v547_v57  ;;  %v620_v10 = vmax.f32 %v588_v2, 0.0 }
  0xeb   : > { %v422_v62 = vpop.f32.mrf.mxu0 }
  0xec   : > { %v589_v0 = vadd.f32 %v1449_v60, %v550_v61  ;;  %v548_v1 = vmul.f32 %v1442_v55, %v422_v62  ;;  %v618_v7 = vmax.f32 %v586_v63, 0.0 }
  0xed   : > { %v1183_v3 = vpop.f32.mrf.mxu0 }
  0xee   : > { %v587_v4 = vadd.f32 %v1449_v60, %v548_v1  ;;  %v621_v5 = vmax.f32 %v589_v0, 0.0  ;;  %v553_v11 = vmul.f32 %v1183_v3, %v1442_v55 }
  0xef   : > { %v435_v6 = vpop.f32.mrf.mxu0 }
  0xf0   : > { %v619_v8 = vmax.f32 %v587_v4, 0.0  ;;  %v551_v9 = vmul.f32 %v1442_v55, %v435_v6  ;;  %v651_v15 = vpack.c.bf16 %v621_v5, %v620_v10  ;;  %v592_v20 = vadd.f32 %v1449_v60, %v553_v11 }
  0xf1   : > { %v1184_v12 = vpop.f32.mrf.mxu0 }
  0xf2   : > { %v554_v13 = vmul.f32 %v1184_v12, %v1442_v55  ;;  %v650_v14 = vpack.c.bf16 %v619_v8, %v618_v7  ;;  %v590_v17 = vadd.f32 %v1449_v60, %v551_v9  ;;  %v624_v28 = vmax.f32 %v592_v20, 0.0 }
  0xf3   : > { %v438_v16 = vpop.f32.mrf.mxu0 }
  0xf4   : > { %v593_v18 = vadd.f32 %v1449_v60, %v554_v13  ;;  %v552_v19 = vmul.f32 %v1442_v55, %v438_v16  ;;  %1217 = vmatprep.mubr.msk.bf16.mxu1 %vm698_vm1, %v650_v14  ;;  %v622_v25 = vmax.f32 %v590_v17, 0.0 }
  0xf5   : > { %v1187_v21 = vpop.f32.mrf.mxu0  ;;  %1218 = vmatmul.mubr.msk.bf16.vlgmr.msra.gmra.mxu1 %vm698_vm1, %v651_v15 }
  0xf6   : > { %v591_v22 = vadd.f32 %v1449_v60, %v552_v19  ;;  %v625_v23 = vmax.f32 %v593_v18, 0.0  ;;  %v557_v29 = vmul.f32 %v1187_v21, %v1442_v55 }
  0xf7   : > { %v451_v24 = vpop.f32.mrf.mxu0 }
  0xf8   : > { %v623_v26 = vmax.f32 %v591_v22, 0.0  ;;  %v555_v27 = vmul.f32 %v1442_v55, %v451_v24  ;;  %v653_v33 = vpack.c.bf16 %v625_v23, %v624_v28  ;;  %v596_v38 = vadd.f32 %v1449_v60, %v557_v29 }
  0xf9   : > { %v1188_v30 = vpop.f32.mrf.mxu0 }
  0xfa   : > { %v652_v31 = vpack.c.bf16 %v623_v26, %v622_v25  ;;  %v558_v32 = vmul.f32 %v1188_v30, %v1442_v55  ;;  %v594_v35 = vadd.f32 %v1449_v60, %v555_v27  ;;  %v628_v46 = vmax.f32 %v596_v38, 0.0 }
  0xfb   : > { %v454_v34 = vpop.f32.mrf.mxu0 }
  0xfc   : > { %v597_v36 = vadd.f32 %v1449_v60, %v558_v32  ;;  %v556_v37 = vmul.f32 %v1442_v55, %v454_v34  ;;  %1221 = vmatprep.mubr.msk.bf16.mxu1 %vm698_vm1, %v652_v31  ;;  %v626_v43 = vmax.f32 %v594_v35, 0.0 }
  0xfd   : > { %v1191_v39 = vpop.f32.mrf.mxu0  ;;  %1222 = vmatmul.mubr.msk.bf16.gmra.mxu1 %vm698_vm1, %v653_v33 }
  0xfe   : > { %v595_v40 = vadd.f32 %v1449_v60, %v556_v37  ;;  %v629_v41 = vmax.f32 %v597_v36, 0.0  ;;  %v561_v47 = vmul.f32 %v1191_v39, %v1442_v55 }
  0xff   : > { %v467_v42 = vpop.f32.mrf.mxu0 }
 0x100   : > { %v627_v44 = vmax.f32 %v595_v40, 0.0  ;;  %v559_v45 = vmul.f32 %v1442_v55, %v467_v42  ;;  %v655_v51 = vpack.c.bf16 %v629_v41, %v628_v46  ;;  %v600_v57 = vadd.f32 %v1449_v60, %v561_v47 }
 0x101   : > { %v1192_v48 = vpop.f32.mrf.mxu0 }
 0x102   : > { %v654_v49 = vpack.c.bf16 %v627_v44, %v626_v43  ;;  %v562_v50 = vmul.f32 %v1192_v48, %v1442_v55  ;;  %v598_v53 = vadd.f32 %v1449_v60, %v559_v45  ;;  %v632_v2 = vmax.f32 %v600_v57, 0.0 }
 0x103   : > { %v470_v52 = vpop.f32.mrf.mxu0 }
 0x104   : > { %v601_v54 = vadd.f32 %v1449_v60, %v562_v50  ;;  %v560_v56 = vmul.f32 %v1442_v55, %v470_v52  ;;  %1225 = vmatprep.mubr.msk.bf16.mxu1 %vm698_vm1, %v654_v49  ;;  %v630_v63 = vmax.f32 %v598_v53, 0.0 }
 0x105   : > { %v1195_v58 = vpop.f32.mrf.mxu0  ;;  %1226 = vmatmul.mubr.msk.bf16.gmra.mxu1 %vm698_vm1, %v655_v51 }
 0x106   : > { %v599_v59 = vadd.f32 %v1449_v60, %v560_v56  ;;  %v633_v61 = vmax.f32 %v601_v54, 0.0  ;;  %v565_v3 = vmul.f32 %v1195_v58, %v1442_v55 }
 0x107   : > { %v483_v62 = vpop.f32.mrf.mxu0 }
 0x108   : > { %v631_v0 = vmax.f32 %v599_v59, 0.0  ;;  %v563_v1 = vmul.f32 %v1442_v55, %v483_v62  ;;  %v657_v7 = vpack.c.bf16 %v633_v61, %v632_v2  ;;  %v604_v12 = vadd.f32 %v1449_v60, %v565_v3 }
 0x109   : > { %v1196_v4 = vpop.f32.mrf.mxu0 }
 0x10a   : > { %v656_v5 = vpack.c.bf16 %v631_v0, %v630_v63  ;;  %v566_v6 = vmul.f32 %v1196_v4, %v1442_v55  ;;  %v602_v9 = vadd.f32 %v1449_v60, %v563_v1  ;;  %v636_v20 = vmax.f32 %v604_v12, 0.0 }
 0x10b   : > { %v486_v8 = vpop.f32.mrf.mxu0 }
 0x10c   : > { %v605_v10 = vadd.f32 %v1449_v60, %v566_v6  ;;  %v564_v11 = vmul.f32 %v1442_v55, %v486_v8  ;;  %1229 = vmatprep.mubr.msk.bf16.mxu1 %vm698_vm1, %v656_v5  ;;  %v634_v17 = vmax.f32 %v602_v9, 0.0 }
 0x10d   : > { %v1199_v13 = vpop.f32.mrf.mxu0  ;;  %1230 = vmatmul.mubr.msk.bf16.gmra.mxu1 %vm698_vm1, %v657_v7 }
 0x10e   : > { %v603_v14 = vadd.f32 %v1449_v60, %v564_v11  ;;  %v637_v15 = vmax.f32 %v605_v10, 0.0  ;;  %v569_v21 = vmul.f32 %v1199_v13, %v1442_v55  ;;  %v1534_v13 = vld [vmem:[%s1679_s5] ss:$0 sm:$0xff] }
 0x10f   : > { %v499_v16 = vpop.f32.mrf.mxu0 }
 0x110   : > { %v635_v18 = vmax.f32 %v603_v14, 0.0  ;;  %v567_v19 = vmul.f32 %v1442_v55, %v499_v16  ;;  %v659_v25 = vpack.c.bf16 %v637_v15, %v636_v20  ;;  %v608_v30 = vadd.f32 %v1449_v60, %v569_v21 }
 0x111   : > { %v1200_v22 = vpop.f32.mrf.mxu0 }
 0x112   : > { %v658_v23 = vpack.c.bf16 %v635_v18, %v634_v17  ;;  %v570_v24 = vmul.f32 %v1200_v22, %v1442_v55  ;;  %v606_v27 = vadd.f32 %v1449_v60, %v567_v19  ;;  %v640_v38 = vmax.f32 %v608_v30, 0.0 }
 0x113   : > { %v502_v26 = vpop.f32.mrf.mxu0 }
 0x114   : > { %v609_v28 = vadd.f32 %v1449_v60, %v570_v24  ;;  %v568_v29 = vmul.f32 %v1442_v55, %v502_v26  ;;  %1233 = vmatprep.mubr.msk.bf16.mxu1 %vm698_vm1, %v658_v23  ;;  %v638_v35 = vmax.f32 %v606_v27, 0.0 }
 0x115   : > { %v1203_v31 = vpop.f32.mrf.mxu0  ;;  %1234 = vmatmul.mubr.msk.bf16.gmra.mxu1 %vm698_vm1, %v659_v25 }
 0x116   : > { %v607_v32 = vadd.f32 %v1449_v60, %v568_v29  ;;  %v641_v33 = vmax.f32 %v609_v28, 0.0  ;;  %v573_v39 = vmul.f32 %v1203_v31, %v1442_v55 }
 0x117   : > { %v515_v34 = vpop.f32.mrf.mxu0 }
 0x118   : > { %v639_v36 = vmax.f32 %v607_v32, 0.0  ;;  %v571_v37 = vmul.f32 %v1442_v55, %v515_v34  ;;  %v661_v43 = vpack.c.bf16 %v641_v33, %v640_v38  ;;  %v612_v48 = vadd.f32 %v1449_v60, %v573_v39 }
 0x119   : > { %v1204_v40 = vpop.f32.mrf.mxu0 }
 0x11a   : > { %v660_v41 = vpack.c.bf16 %v639_v36, %v638_v35  ;;  %v574_v42 = vmul.f32 %v1204_v40, %v1442_v55  ;;  %v610_v45 = vadd.f32 %v1449_v60, %v571_v37  ;;  %v644_v57 = vmax.f32 %v612_v48, 0.0 }
 0x11b   : > { %v518_v44 = vpop.f32.mrf.mxu0 }
 0x11c   : > { %v613_v46 = vadd.f32 %v1449_v60, %v574_v42  ;;  %v572_v47 = vmul.f32 %v1442_v55, %v518_v44  ;;  %1237 = vmatprep.mubr.msk.bf16.mxu1 %vm698_vm1, %v660_v41  ;;  %v642_v53 = vmax.f32 %v610_v45, 0.0 }
 0x11d   : > { %v1207_v49 = vpop.f32.mrf.mxu0  ;;  %1238 = vmatmul.mubr.msk.bf16.gmra.mxu1 %vm698_vm1, %v661_v43 }
 0x11e   : > { %v611_v50 = vadd.f32 %v1449_v60, %v572_v47  ;;  %v645_v51 = vmax.f32 %v613_v46, 0.0  ;;  %v577_v58 = vmul.f32 %v1207_v49, %v1442_v55 }
 0x11f   : > { %v531_v52 = vpop.f32.mrf.mxu0 }
 0x120   : > { %v643_v54 = vmax.f32 %v611_v50, 0.0  ;;  %v575_v56 = vmul.f32 %v1442_v55, %v531_v52  ;;  %v663_v63 = vpack.c.bf16 %v645_v51, %v644_v57  ;;  %v616_v4 = vadd.f32 %v1449_v60, %v577_v58 }
 0x121   : > { %v1208_v59 = vpop.f32.mrf.mxu0 }
 0x122   : > { %v662_v61 = vpack.c.bf16 %v643_v54, %v642_v53  ;;  %v578_v62 = vmul.f32 %v1208_v59, %v1442_v55  ;;  %v614_v1 = vadd.f32 %v1449_v60, %v575_v56  ;;  %v648_v9 = vmax.f32 %v616_v4, 0.0 }
 0x123   : > { %v534_v0 = vpop.f32.mrf.mxu0 }
 0x124   : > { %v617_v2 = vadd.f32 %v1449_v60, %v578_v62  ;;  %v576_v3 = vmul.f32 %v1442_v55, %v534_v0  ;;  %1241 = vmatprep.mubr.msk.bf16.mxu1 %vm698_vm1, %v662_v61  ;;  %v646_v7 = vmax.f32 %v614_v1, 0.0  ;;  %v1529_v55 = vstv %s1092_s27 }
 0x125   : > { %1242 = vmatmul.mubr.msk.bf16.gmra.mxu1 %vm698_vm1, %v663_v63 }
 0x126   : > { %v615_v5 = vadd.f32 %v1449_v60, %v576_v3  ;;  %v649_v6 = vmax.f32 %v617_v2, 0.0 }
 0x128   : > { %v647_v8 = vmax.f32 %v615_v5, 0.0  ;;  %v665_v11 = vpack.c.bf16 %v649_v6, %v648_v9 }
 0x12a   : > { %v664_v10 = vpack.c.bf16 %v647_v8, %v646_v7 }
 0x12c   : > { %1245 = vmatprep.mubr.msk.bf16.mxu1 %vm698_vm1, %v664_v10 }
 0x12d   : > { %1246 = vmatmul.mubr.msk.bf16.gmra.mxu1 %vm698_vm1, %v665_v11 }
 0x1b5   : > { %v1219_v12 = vpop.f32.mrf.mxu1 }
 0x1b6   : > { %v911_v60 = vmul.f32 %v1219_v12, %v1529_v55 }
 0x1b7   : > { %v781_v14 = vpop.f32.mrf.mxu1 }
 0x1b8   : > { %v950_v15 = vadd.f32 %v1534_v13, %v911_v60  ;;  %v909_v16 = vmul.f32 %v1529_v55, %v781_v14 }
 0x1b9   : > { %v1220_v17 = vpop.f32.mrf.mxu1 }
 0x1ba   : > { %983 = vst.msk [vmem:[%s1542_s9 + $0x10] sm:$0xff] %vm980_vm2, %v950_v15  ;;  %v948_v18 = vadd.f32 %v1534_v13, %v909_v16  ;;  %v912_v19 = vmul.f32 %v1220_v17, %v1529_v55 }
 0x1bb   : > { %v784_v20 = vpop.f32.mrf.mxu1 }
 0x1bc   : > { %981 = vst.msk [vmem:[%s1542_s9] sm:$0xff] %vm980_vm2, %v948_v18  ;;  %v951_v21 = vadd.f32 %v1534_v13, %v912_v19  ;;  %v910_v22 = vmul.f32 %v1529_v55, %v784_v20 }
 0x1bd   : > { %v1223_v23 = vpop.f32.mrf.mxu1 }
 0x1be   : > { %984 = vst.msk [vmem:[%s1542_s9 + $0x18] sm:$0xff] %vm980_vm2, %v951_v21  ;;  %v949_v24 = vadd.f32 %v1534_v13, %v910_v22  ;;  %v915_v25 = vmul.f32 %v1223_v23, %v1529_v55 }
 0x1bf   : > { %v797_v26 = vpop.f32.mrf.mxu1 }
 0x1c0   : > { %982 = vst.msk [vmem:[%s1542_s9 + $0x8] sm:$0xff] %vm980_vm2, %v949_v24  ;;  %v954_v27 = vadd.f32 %v1534_v13, %v915_v25  ;;  %v913_v28 = vmul.f32 %v1529_v55, %v797_v26 }
 0x1c1   : > { %v1224_v29 = vpop.f32.mrf.mxu1 }
 0x1c2   : > { %987 = vst.msk [vmem:[%s1542_s9 + $0x30] sm:$0xff] %vm980_vm2, %v954_v27  ;;  %v952_v30 = vadd.f32 %v1534_v13, %v913_v28  ;;  %v916_v31 = vmul.f32 %v1224_v29, %v1529_v55 }
 0x1c3   : > { %v800_v32 = vpop.f32.mrf.mxu1 }
 0x1c4   : > { %985 = vst.msk [vmem:[%s1542_s9 + $0x20] sm:$0xff] %vm980_vm2, %v952_v30  ;;  %v955_v33 = vadd.f32 %v1534_v13, %v916_v31  ;;  %v914_v34 = vmul.f32 %v1529_v55, %v800_v32 }
 0x1c5   : > { %v1227_v35 = vpop.f32.mrf.mxu1 }
 0x1c6   : > { %988 = vst.msk [vmem:[%s1542_s9 + $0x38] sm:$0xff] %vm980_vm2, %v955_v33  ;;  %v953_v36 = vadd.f32 %v1534_v13, %v914_v34  ;;  %v919_v37 = vmul.f32 %v1227_v35, %v1529_v55 }
 0x1c7   : > { %v813_v38 = vpop.f32.mrf.mxu1 }
 0x1c8   : > { %986 = vst.msk [vmem:[%s1542_s9 + $0x28] sm:$0xff] %vm980_vm2, %v953_v36  ;;  %v958_v39 = vadd.f32 %v1534_v13, %v919_v37  ;;  %v917_v40 = vmul.f32 %v1529_v55, %v813_v38 }
 0x1c9   : > { %v1228_v41 = vpop.f32.mrf.mxu1 }
 0x1ca   : > { %991 = vst.msk [vmem:[%s1542_s9 + $0x50] sm:$0xff] %vm980_vm2, %v958_v39  ;;  %v956_v42 = vadd.f32 %v1534_v13, %v917_v40  ;;  %v920_v43 = vmul.f32 %v1228_v41, %v1529_v55 }
 0x1cb   : > { %v816_v44 = vpop.f32.mrf.mxu1 }
 0x1cc   : > { %989 = vst.msk [vmem:[%s1542_s9 + $0x40] sm:$0xff] %vm980_vm2, %v956_v42  ;;  %v959_v45 = vadd.f32 %v1534_v13, %v920_v43  ;;  %v918_v46 = vmul.f32 %v1529_v55, %v816_v44 }
 0x1cd   : > { %v1231_v47 = vpop.f32.mrf.mxu1 }
 0x1ce   : > { %992 = vst.msk [vmem:[%s1542_s9 + $0x58] sm:$0xff] %vm980_vm2, %v959_v45  ;;  %v957_v48 = vadd.f32 %v1534_v13, %v918_v46  ;;  %v923_v49 = vmul.f32 %v1231_v47, %v1529_v55 }
 0x1cf   : > { %v829_v50 = vpop.f32.mrf.mxu1 }
 0x1d0   : > { %990 = vst.msk [vmem:[%s1542_s9 + $0x48] sm:$0xff] %vm980_vm2, %v957_v48  ;;  %v962_v51 = vadd.f32 %v1534_v13, %v923_v49  ;;  %v921_v52 = vmul.f32 %v1529_v55, %v829_v50 }
 0x1d1   : > { %v1232_v53 = vpop.f32.mrf.mxu1 }
 0x1d2   : > { %995 = vst.msk [vmem:[%s1542_s9 + $0x70] sm:$0xff] %vm980_vm2, %v962_v51  ;;  %v960_v54 = vadd.f32 %v1534_v13, %v921_v52  ;;  %v924_v56 = vmul.f32 %v1232_v53, %v1529_v55 }
 0x1d3   : > { %v832_v57 = vpop.f32.mrf.mxu1 }
 0x1d4   : > { %993 = vst.msk [vmem:[%s1542_s9 + $0x60] sm:$0xff] %vm980_vm2, %v960_v54  ;;  %v963_v58 = vadd.f32 %v1534_v13, %v924_v56  ;;  %v922_v59 = vmul.f32 %v1529_v55, %v832_v57 }
 0x1d5   : > { %v1235_v61 = vpop.f32.mrf.mxu1 }
 0x1d6   : > { %996 = vst.msk [vmem:[%s1542_s9 + $0x78] sm:$0xff] %vm980_vm2, %v963_v58  ;;  %v961_v62 = vadd.f32 %v1534_v13, %v922_v59  ;;  %v927_v63 = vmul.f32 %v1235_v61, %v1529_v55 }
 0x1d7   : > { %v845_v0 = vpop.f32.mrf.mxu1 }
 0x1d8   : > { %994 = vst.msk [vmem:[%s1542_s9 + $0x68] sm:$0xff] %vm980_vm2, %v961_v62  ;;  %v966_v1 = vadd.f32 %v1534_v13, %v927_v63  ;;  %v925_v2 = vmul.f32 %v1529_v55, %v845_v0 }
 0x1d9   : > { %v1236_v3 = vpop.f32.mrf.mxu1 }
 0x1da   : > { %999 = vst.msk [vmem:[%s1542_s9 + $0x90] sm:$0xff] %vm980_vm2, %v966_v1  ;;  %v964_v4 = vadd.f32 %v1534_v13, %v925_v2  ;;  %v928_v5 = vmul.f32 %v1236_v3, %v1529_v55 }
 0x1db   : > { %v848_v6 = vpop.f32.mrf.mxu1 }
 0x1dc   : > { %997 = vst.msk [vmem:[%s1542_s9 + $0x80] sm:$0xff] %vm980_vm2, %v964_v4  ;;  %v967_v7 = vadd.f32 %v1534_v13, %v928_v5  ;;  %v926_v8 = vmul.f32 %v1529_v55, %v848_v6 }
 0x1dd   : > { %v1239_v9 = vpop.f32.mrf.mxu1 }
 0x1de   : > { %1000 = vst.msk [vmem:[%s1542_s9 + $0x98] sm:$0xff] %vm980_vm2, %v967_v7  ;;  %v965_v10 = vadd.f32 %v1534_v13, %v926_v8  ;;  %v931_v11 = vmul.f32 %v1239_v9, %v1529_v55 }
 0x1df   : > { %v861_v12 = vpop.f32.mrf.mxu1 }
 0x1e0   : > { %998 = vst.msk [vmem:[%s1542_s9 + $0x88] sm:$0xff] %vm980_vm2, %v965_v10  ;;  %v970_v60 = vadd.f32 %v1534_v13, %v931_v11  ;;  %v929_v14 = vmul.f32 %v1529_v55, %v861_v12 }
 0x1e1   : > { %v1240_v15 = vpop.f32.mrf.mxu1 }
 0x1e2   : > { %1003 = vst.msk [vmem:[%s1542_s9 + $0xb0] sm:$0xff] %vm980_vm2, %v970_v60  ;;  %v968_v16 = vadd.f32 %v1534_v13, %v929_v14  ;;  %v932_v17 = vmul.f32 %v1240_v15, %v1529_v55 }
 0x1e3   : > { %v864_v18 = vpop.f32.mrf.mxu1 }
 0x1e4   : > { %1001 = vst.msk [vmem:[%s1542_s9 + $0xa0] sm:$0xff] %vm980_vm2, %v968_v16  ;;  %v971_v19 = vadd.f32 %v1534_v13, %v932_v17  ;;  %v930_v20 = vmul.f32 %v1529_v55, %v864_v18 }
 0x1e5   : > { %v1243_v21 = vpop.f32.mrf.mxu1 }
 0x1e6   : > { %1004 = vst.msk [vmem:[%s1542_s9 + $0xb8] sm:$0xff] %vm980_vm2, %v971_v19  ;;  %v969_v22 = vadd.f32 %v1534_v13, %v930_v20  ;;  %v935_v23 = vmul.f32 %v1243_v21, %v1529_v55 }
 0x1e7   : > { %v877_v24 = vpop.f32.mrf.mxu1 }
 0x1e8   : > { %1002 = vst.msk [vmem:[%s1542_s9 + $0xa8] sm:$0xff] %vm980_vm2, %v969_v22  ;;  %v974_v25 = vadd.f32 %v1534_v13, %v935_v23  ;;  %v933_v26 = vmul.f32 %v1529_v55, %v877_v24 }
 0x1e9   : > { %v1244_v27 = vpop.f32.mrf.mxu1 }
 0x1ea   : > { %1007 = vst.msk [vmem:[%s1542_s9 + $0xd0] sm:$0xff] %vm980_vm2, %v974_v25  ;;  %v972_v28 = vadd.f32 %v1534_v13, %v933_v26  ;;  %v936_v29 = vmul.f32 %v1244_v27, %v1529_v55 }
 0x1eb   : > { %v880_v30 = vpop.f32.mrf.mxu1 }
 0x1ec   : > { %1005 = vst.msk [vmem:[%s1542_s9 + $0xc0] sm:$0xff] %vm980_vm2, %v972_v28  ;;  %v975_v31 = vadd.f32 %v1534_v13, %v936_v29  ;;  %v934_v32 = vmul.f32 %v1529_v55, %v880_v30 }
 0x1ed   : > { %v1247_v33 = vpop.f32.mrf.mxu1 }
 0x1ee   : > { %1008 = vst.msk [vmem:[%s1542_s9 + $0xd8] sm:$0xff] %vm980_vm2, %v975_v31  ;;  %v973_v34 = vadd.f32 %v1534_v13, %v934_v32  ;;  %v939_v35 = vmul.f32 %v1247_v33, %v1529_v55 }
 0x1ef   : > { %v893_v36 = vpop.f32.mrf.mxu1 }
 0x1f0   : > { %1006 = vst.msk [vmem:[%s1542_s9 + $0xc8] sm:$0xff] %vm980_vm2, %v973_v34  ;;  %v978_v37 = vadd.f32 %v1534_v13, %v939_v35  ;;  %v937_v38 = vmul.f32 %v1529_v55, %v893_v36 }
 0x1f1   : > { %v1248_v39 = vpop.f32.mrf.mxu1 }
 0x1f2   : > { %1011 = vst.msk [vmem:[%s1542_s9 + $0xf0] sm:$0xff] %vm980_vm2, %v978_v37  ;;  %v976_v40 = vadd.f32 %v1534_v13, %v937_v38  ;;  %v940_v41 = vmul.f32 %v1248_v39, %v1529_v55 }
 0x1f3   : > { %v896_v42 = vpop.f32.mrf.mxu1 }
 0x1f4   : > { %1009 = vst.msk [vmem:[%s1542_s9 + $0xe0] sm:$0xff] %vm980_vm2, %v976_v40  ;;  %v979_v43 = vadd.f32 %v1534_v13, %v940_v41  ;;  %v938_v44 = vmul.f32 %v1529_v55, %v896_v42 }
 0x1f6   : > { %1012 = vst.msk [vmem:[%s1542_s9 + $0xf8] sm:$0xff] %vm980_vm2, %v979_v43  ;;  %v977_v45 = vadd.f32 %v1534_v13, %v938_v44 }
 0x1f8   : > { %1010 = vst.msk [vmem:[%s1542_s9 + $0xe8] sm:$0xff] %vm980_vm2, %v977_v45 }
 0x1f9 PF: > { %s17_s21 = sadd.s32 1, %s1299_s21  }
 0x1fa   : > { %p14_p1 = scmp.ge.s32.totalorder %s17_s21, 4  }
 0x1fc   :  { %16 = sbr.rel (!%p14_p1) target bundleno = 1 (0x1), region = 79 }
 0x201   :  { %1035 = vsyncpa [#allocation3], 1 }
 0x202   :  { %1037 = vsyncpa [#allocation3 + $0x1], 1 }

</bundles_post_ra>
